<compile_context>
chip_gen: v5e
topology: v5e:2x2
jax: 0.10.0
libtpu: 0.0.40
codegen_flags: <defaults>
</compile_context>

<pallas_src>
import jax
import jax.numpy as jnp
from jax.experimental import pallas as pl
from jax.experimental.pallas import tpu as pltpu


_COMPILER_PARAMS = pltpu.CompilerParams(
    dimension_semantics=("parallel",),
    vmem_limit_bytes=32 * 1024 * 1024,
)


# ----------------------------------------------------------------------------
# Pallas kernels
# ----------------------------------------------------------------------------

def _bn_relu_kernel(x_ref, scale_ref, shift_ref, o_ref):
    # out = relu(x * scale + shift)   (eval-mode BatchNorm folded into scale/shift)
    x = x_ref[...].astype(jnp.float32)
    o_ref[...] = jnp.maximum(x * scale_ref[...] + shift_ref[...], 0.0).astype(o_ref.dtype)


def _mm_bn_relu_kernel(x_ref, w_ref, scale_ref, shift_ref, o_ref):
    # conv (as a single tap-folded matmul) + fused bn2 + ReLU epilogue
    acc = jnp.dot(x_ref[...], w_ref[...], preferred_element_type=jnp.float32)
    o_ref[...] = jnp.maximum(acc * scale_ref[...] + shift_ref[...], 0.0).astype(o_ref.dtype)


def _mm_residual_kernel(x_ref, w_ref, r_ref, o_ref):
    # conv2 + fused identity-shortcut residual add (equal in/out planes)
    acc = jnp.dot(x_ref[...], w_ref[...], preferred_element_type=jnp.float32)
    o_ref[...] = (acc + r_ref[...].astype(jnp.float32)).astype(o_ref.dtype)


def _mm_shortcut_kernel(x_ref, w_ref, xs_ref, ws_ref, o_ref):
    # conv2 + fused 1x1 strided shortcut conv (unequal planes):
    # shortcut input is the (already strided) center im2col tap of conv1.
    acc = jnp.dot(x_ref[...], w_ref[...], preferred_element_type=jnp.float32)
    acc = acc + jnp.dot(xs_ref[...], ws_ref[...], preferred_element_type=jnp.float32)
    o_ref[...] = acc.astype(o_ref.dtype)


# ----------------------------------------------------------------------------
# Tiling helpers + Pallas wrappers
# ----------------------------------------------------------------------------

def _round_up(x, m):
    return ((x + m - 1) // m) * m


def _tile_rows(M, tm_max=512):
    """Pick a row tile (<= tm_max, multiple of 8) and the padded row count."""
    tm = min(tm_max, _round_up(M, 8))
    Mp = _round_up(M, tm)
    return tm, Mp


def _pad_rows(x, Mp):
    M = x.shape[0]
    if Mp == M:
        return x
    return jnp.pad(x, ((0, Mp - M), (0, 0)))


def _mm_call(kernel, arrays, in_specs, Mp, tm, Cout, out_dtype):
    return pl.pallas_call(
        kernel,
        out_shape=jax.ShapeDtypeStruct((Mp, Cout), out_dtype),
        grid_spec=pltpu.PrefetchScalarGridSpec(
            num_scalar_prefetch=0,
            grid=(Mp // tm,),
            in_specs=in_specs,
            out_specs=pl.BlockSpec((tm, Cout), lambda i: (i, 0)),
        ),
        compiler_params=_COMPILER_PARAMS,
    )(*arrays)


def bn_relu(x2d, scale, shift, tm_max=512):
    """x2d: (M, C); scale/shift: (1, C) f32. Returns relu(x*scale+shift) in bf16."""
    M, C = x2d.shape
    tm, Mp = _tile_rows(M, tm_max)
    xp = _pad_rows(x2d, Mp)
    y = pl.pallas_call(
        _bn_relu_kernel,
        out_shape=jax.ShapeDtypeStruct((Mp, C), jnp.bfloat16),
        grid_spec=pltpu.PrefetchScalarGridSpec(
            num_scalar_prefetch=0,
            grid=(Mp // tm,),
            in_specs=[
                pl.BlockSpec((tm, C), lambda i: (i, 0)),
                pl.BlockSpec((1, C), lambda i: (0, 0)),
                pl.BlockSpec((1, C), lambda i: (0, 0)),
            ],
            out_specs=pl.BlockSpec((tm, C), lambda i: (i, 0)),
        ),
        compiler_params=_COMPILER_PARAMS,
    )(xp, scale, shift)
    return y if Mp == M else y[:M]


def matmul_bn_relu(cols, w, scale, shift, out_dtype=jnp.bfloat16, tm_max=512):
    """(M, K) @ (K, Cout) with fused bn+relu epilogue."""
    M, K = cols.shape
    Cout = w.shape[1]
    tm, Mp = _tile_rows(M, tm_max)
    colsp = _pad_rows(cols, Mp)
    in_specs = [
        pl.BlockSpec((tm, K), lambda i: (i, 0)),
        pl.BlockSpec((K, Cout), lambda i: (0, 0)),   # weight: VMEM-resident
        pl.BlockSpec((1, Cout), lambda i: (0, 0)),
        pl.BlockSpec((1, Cout), lambda i: (0, 0)),
    ]
    y = _mm_call(_mm_bn_relu_kernel, (colsp, w, scale, shift),
                 in_specs, Mp, tm, Cout, out_dtype)
    return y if Mp == M else y[:M]


def matmul_residual(cols, w, residual, out_dtype=jnp.float32, tm_max=512):
    """(M, K) @ (K, Cout) + residual   (identity shortcut fused)."""
    M, K = cols.shape
    Cout = w.shape[1]
    tm, Mp = _tile_rows(M, tm_max)
    colsp = _pad_rows(cols, Mp)
    rp = _pad_rows(residual, Mp)
    in_specs = [
        pl.BlockSpec((tm, K), lambda i: (i, 0)),
        pl.BlockSpec((K, Cout), lambda i: (0, 0)),
        pl.BlockSpec((tm, Cout), lambda i: (i, 0)),
    ]
    y = _mm_call(_mm_residual_kernel, (colsp, w, rp),
                 in_specs, Mp, tm, Cout, out_dtype)
    return y if Mp == M else y[:M]


def matmul_shortcut(cols, w, xs, ws, out_dtype=jnp.float32, tm_max=512):
    """(M, K) @ (K, Cout) + (M, Cin) @ (Cin, Cout)   (1x1 shortcut conv fused)."""
    M, K = cols.shape
    Cout = w.shape[1]
    Cin = xs.shape[1]
    tm, Mp = _tile_rows(M, tm_max)
    colsp = _pad_rows(cols, Mp)
    xsp = _pad_rows(xs, Mp)
    in_specs = [
        pl.BlockSpec((tm, K), lambda i: (i, 0)),
        pl.BlockSpec((K, Cout), lambda i: (0, 0)),
        pl.BlockSpec((tm, Cin), lambda i: (i, 0)),
        pl.BlockSpec((Cin, Cout), lambda i: (0, 0)),
    ]
    y = _mm_call(_mm_shortcut_kernel, (colsp, w, xsp, ws),
                 in_specs, Mp, tm, Cout, out_dtype)
    return y if Mp == M else y[:M]


# ----------------------------------------------------------------------------
# JAX glue: im2col (layout plumbing only), parameters, block forward
# ----------------------------------------------------------------------------

def im2col_3x3(x_nhwc, stride):
    """3x3 / pad=1 / given stride -> (N*Ho*Wo, 9*C) tap-folded matrix."""
    N, H, W, C = x_nhwc.shape
    xp = jnp.pad(x_nhwc, ((0, 0), (1, 1), (1, 1), (0, 0)))
    Ho = (H + 2 - 3) // stride + 1
    Wo = (W + 2 - 3) // stride + 1
    cols = []
    for dy in range(3):
        for dx in range(3):
            sl = xp[:, dy:dy + stride * (Ho - 1) + 1:stride,
                    dx:dx + stride * (Wo - 1) + 1:stride, :]
            cols.append(sl.reshape(N * Ho * Wo, C))
    return jnp.concatenate(cols, axis=1), (Ho, Wo)


def make_basic_block_params(key, in_planes, out_planes, eps=1e-5):
    ks = jax.random.split(key, 11)

    def nrm(k, shape, s=0.1):
        return (s * jax.random.normal(k, shape)).astype(jnp.float32)

    g1 = 1.0 + nrm(ks[0], (in_planes,))
    b1 = nrm(ks[1], (in_planes,))
    m1 = nrm(ks[2], (in_planes,))
    v1 = 1.0 + jnp.abs(nrm(ks[3], (in_planes,)))
    g2 = 1.0 + nrm(ks[4], (out_planes,))
    b2 = nrm(ks[5], (out_planes,))
    m2 = nrm(ks[6], (out_planes,))
    v2 = 1.0 + jnp.abs(nrm(ks[7], (out_planes,)))

    s1 = g1 / jnp.sqrt(v1 + eps)
    s2 = g2 / jnp.sqrt(v2 + eps)
    p = dict(
        equal=(in_planes == out_planes),
        bn1_scale=s1, bn1_shift=b1 - m1 * s1,
        bn2_scale=s2, bn2_shift=b2 - m2 * s2,
        conv1_w=nrm(ks[8], (out_planes, in_planes, 3, 3)),   # OIHW, like PyTorch
        conv2_w=nrm(ks[9], (out_planes, out_planes, 3, 3)),
    )
    if in_planes != out_planes:
        p['shortcut_w'] = nrm(ks[10], (out_planes, in_planes, 1, 1))
    return p


def make_network_block_params(key, nb_layers, in_planes, out_planes):
    keys = jax.random.split(key, nb_layers)
    params = []
    for i in range(nb_layers):
        cin = in_planes if i == 0 else out_planes
        params.append(make_basic_block_params(keys[i], cin, out_planes))
    return params


def prepare_block_params(p):
    """One-time conversion of PyTorch-layout params into kernel layout
    (tap-folded bf16 weights, (1,C) f32 scale/shift). Done outside the hot path."""
    Cout, Cin = p['conv1_w'].shape[:2]
    q = dict(equal=p['equal'], cin=Cin, cout=Cout)
    q['bn1_scale'] = p['bn1_scale'].reshape(1, Cin)
    q['bn1_shift'] = p['bn1_shift'].reshape(1, Cin)
    q['bn2_scale'] = p['bn2_scale'].reshape(1, Cout)
    q['bn2_shift'] = p['bn2_shift'].reshape(1, Cout)
    # OIHW -> (kh, kw, Cin, Cout) -> (9*Cin, Cout), matching im2col tap/col order.
    q['w1'] = jnp.transpose(p['conv1_w'], (2, 3, 1, 0)).reshape(9 * Cin, Cout).astype(jnp.bfloat16)
    q['w2'] = jnp.transpose(p['conv2_w'], (2, 3, 1, 0)).reshape(9 * Cout, Cout).astype(jnp.bfloat16)
    if not p['equal']:
        q['ws'] = jnp.transpose(p['shortcut_w'].reshape(Cout, Cin)).astype(jnp.bfloat16)
    return q


def prepare_network_block_params(params):
    return [prepare_block_params(p) for p in params]


def basic_block_forward(x_nhwc, q, stride):
    """WideResNet BasicBlock forward (dropRate=0.0). Hot path in Pallas."""
    N, H, W, Cin = x_nhwc.shape
    Cout = q['cout']

    # relu(bn1(x))  -> bf16 activations (halves HBM traffic for im2col)
    act = bn_relu(x_nhwc.reshape(-1, Cin), q['bn1_scale'], q['bn1_shift'])
    act = act.reshape(N, H, W, Cin)

    # conv1 (3x3, stride, pad 1) as a single tap-folded matmul, with fused bn2+ReLU
    cols1, (Ho, Wo) = im2col_3x3(act, stride)            # (M, 9*Cin) bf16
    out = matmul_bn_relu(cols1, q['w1'], q['bn2_scale'], q['bn2_shift'])  # (M, Cout) bf16
    # dropRate == 0.0 => no dropout

    # conv2 (3x3, stride 1, pad 1) with fused shortcut
    cols2, _ = im2col_3x3(out.reshape(N, Ho, Wo, Cout), 1)   # (M, 9*Cout) bf16
    if q['equal']:
        residual = x_nhwc.reshape(-1, Cout).astype(jnp.float32)
        y = matmul_residual(cols2, q['w2'], residual, out_dtype=jnp.float32)
    else:
        # convShortcut(relu(bn1(x))) == 1x1/stride conv of act; its input is
        # exactly the (already strided) center tap of conv1's im2col matrix.
        xs = cols1[:, 4 * Cin:5 * Cin]                      # (M, Cin) bf16
        y = matmul_shortcut(cols2, q['w2'], xs, q['ws'], out_dtype=jnp.float32)
    return y.reshape(N, Ho, Wo, Cout)


def network_block_forward(x_nchw, prepared_params, strides):
    # layout: NCHW in/out (PyTorch convention), NHWC internally.
    x = jnp.transpose(x_nchw, (0, 2, 3, 1)).astype(jnp.float32)
    for q, s in zip(prepared_params, strides):
        x = basic_block_forward(x, q, s)
    return jnp.transpose(x, (0, 3, 1, 2))


# ----------------------------------------------------------------------------
# Pure-JAX f32 reference (for correctness check only)
# ----------------------------------------------------------------------------

def _ref_conv(x_nhwc, w_oihw, stride, pad):
    w_hwio = jnp.transpose(w_oihw, (2, 3, 1, 0))
    return jax.lax.conv_general_dilated(
        x_nhwc, w_hwio, (stride, stride), [(pad, pad), (pad, pad)],
        dimension_numbers=('NHWC', 'HWIO', 'NHWC'))


def _ref_basic_block(x, p, stride):
    act = jnp.maximum(x * p['bn1_scale'] + p['bn1_shift'], 0.0)
    out = _ref_conv(act, p['conv1_w'], stride, 1)
    out = jnp.maximum(out * p['bn2_scale'] + p['bn2_shift'], 0.0)
    out = _ref_conv(out, p['conv2_w'], 1, 1)
    shortcut = x if p['equal'] else _ref_conv(act, p['shortcut_w'], stride, 0)
    return shortcut + out


def network_block_reference(x_nchw, layer_params, strides):
    x = jnp.transpose(x_nchw, (0, 2, 3, 1))
    for p, s in zip(layer_params, strides):
        x = _ref_basic_block(x, p, s)
    return jnp.transpose(x, (0, 3, 1, 2))


# ----------------------------------------------------------------------------
if __name__ == "__main__":
    key = jax.random.PRNGKey(0)
    kx, kp = jax.random.split(key)

    # NetworkBlock(nb_layers=2, in_planes=8, out_planes=16, block=BasicBlock, stride=2)
    N, Cin, H, W = 2, 8, 16, 16
    Cout, nb_layers, stride = 16, 2, 2

    x = jax.random.normal(kx, (N, Cin, H, W), dtype=jnp.float32)
    params = make_network_block_params(kp, nb_layers, Cin, Cout)
    prepared = prepare_network_block_params(params)
    strides = [stride] + [1] * (nb_layers - 1)

    y = network_block_forward(x, prepared, strides)
    y = jax.block_until_ready(y)

    assert y.shape == (N, Cout, H // stride, W // stride), y.shape

    y_ref = network_block_reference(x, params, strides)
    # Tolerance sized for bf16 MXU operands (f32 accumulation) over two blocks.
    max_err = float(jnp.max(jnp.abs(y - y_ref)))
    assert jnp.allclose(y, y_ref, atol=5e-2, rtol=5e-2), max_err

    # TODO(synk): dropout (dropRate>0) and training-mode BN stat updates are not
    # implemented; the module default dropRate=0.0 / eval-mode BN is what is modeled.
    print("KERNEL_OK")
</pallas_src>

<mosaic_0001>
module attributes {stable_mosaic.version = 11 : i64} {
  func.func @_bn_relu_kernel(%arg0: i32, %arg1: memref<512x8xf32, #tpu.memory_space<vmem>>, %arg2: memref<1x8xf32, #tpu.memory_space<vmem>>, %arg3: memref<1x8xf32, #tpu.memory_space<vmem>>, %arg4: memref<512x8xbf16, #tpu.memory_space<vmem>>) attributes {dimension_semantics = [#tpu.dimension_semantics<parallel>], iteration_bounds = array<i64: 1>, scalar_prefetch = 0 : i64, scratch_operands = 0 : i64, tpu.core_type = #tpu.core_type<tc>, window_params = [{transform_indices = @transform_0, window_bounds = array<i64: 512, 8>}, {pipeline_mode = #tpu.pipeline_mode<synchronous>, transform_indices = @transform_1, window_bounds = array<i64: 1, 8>}, {pipeline_mode = #tpu.pipeline_mode<synchronous>, transform_indices = @transform_2, window_bounds = array<i64: 1, 8>}, {transform_indices = @transform_3, window_bounds = array<i64: 512, 8>}]} {
    %c0 = arith.constant 0 : index
    %c0_0 = arith.constant 0 : index
    %0 = vector.load %arg1[%c0, %c0_0] : memref<512x8xf32, #tpu.memory_space<vmem>>, vector<512x8xf32>
    %c0_1 = arith.constant 0 : index
    %c0_2 = arith.constant 0 : index
    %1 = vector.load %arg2[%c0_1, %c0_2] : memref<1x8xf32, #tpu.memory_space<vmem>>, vector<1x8xf32>
    %2 = vector.broadcast %1 : vector<1x8xf32> to vector<512x8xf32>
    %3 = arith.mulf %0, %2 : vector<512x8xf32>
    %c0_3 = arith.constant 0 : index
    %c0_4 = arith.constant 0 : index
    %4 = vector.load %arg3[%c0_3, %c0_4] : memref<1x8xf32, #tpu.memory_space<vmem>>, vector<1x8xf32>
    %5 = vector.broadcast %4 : vector<1x8xf32> to vector<512x8xf32>
    %6 = arith.addf %3, %5 : vector<512x8xf32>
    %cst = arith.constant 0.000000e+00 : f32
    %7 = vector.broadcast %cst : f32 to vector<512x8xf32>
    %8 = arith.maximumf %6, %7 : vector<512x8xf32>
    %9 = arith.truncf %8 : vector<512x8xf32> to vector<512x8xbf16>
    %c0_5 = arith.constant 0 : index
    %c0_6 = arith.constant 0 : index
    %10 = vector.load %arg4[%c0_5, %c0_6] : memref<512x8xbf16, #tpu.memory_space<vmem>>, vector<512x8xbf16>
    tpu.vector_store %arg4[%c0_5, %c0_6], %9 {strides = array<i32>} : memref<512x8xbf16, #tpu.memory_space<vmem>>, vector<512x8xbf16>,
    return
  }
  func.func @transform_0(%arg0: i32) -> (i32, i32) {
    %c0_i32 = arith.constant 0 : i32
    %c0_i32_0 = arith.constant 0 : i32
    return %arg0, %c0_i32 : i32, i32
  }
  func.func @transform_1(%arg0: i32) -> (i32, i32) {
    %c0_i32 = arith.constant 0 : i32
    %c0_i32_0 = arith.constant 0 : i32
    %c0_i32_1 = arith.constant 0 : i32
    return %c0_i32, %c0_i32_0 : i32, i32
  }
  func.func @transform_2(%arg0: i32) -> (i32, i32) {
    %c0_i32 = arith.constant 0 : i32
    %c0_i32_0 = arith.constant 0 : i32
    %c0_i32_1 = arith.constant 0 : i32
    return %c0_i32, %c0_i32_0 : i32, i32
  }
  func.func @transform_3(%arg0: i32) -> (i32, i32) {
    %c0_i32 = arith.constant 0 : i32
    %c0_i32_0 = arith.constant 0 : i32
    return %arg0, %c0_i32 : i32, i32
  }
}

</mosaic_0001>

<bundles_post_ra>
// kernel: tpu_custom_call.1
= control target key start
LH: loop header
LB: loop body
LE: loop exit
PB: predicated region body
PF: predicated region fallthrough
CT: control target
= control target key end

     0   :  { %vm342_vm0 = vcmask 60416   ;;  %s1019_s0 = inlined_call_operand.vmem [shape: f32[512,8], index: 0, kind: input, shape index: {}]   ;;  %s1020_s1 = inlined_call_operand.vmem [shape: f32[1,8], index: 1, kind: input, shape index: {}]   ;;  %s1021_s2 = inlined_call_operand.vmem [shape: f32[1,8], index: 2, kind: input, shape index: {}]   ;;  %s1022_s3 = inlined_call_operand.vmem [shape: bf16[512,8], index: 3, kind: output, shape index: {}]  }
   0x1   :  { %v14_v0 = vld [vmem:[%s1019_s0] sm:$0xff]  ;;  %v15_v3 = vld [vmem:[%s1019_s0 + $0x8] sm:$0xff]  ;;  %v16_v6 = vld [vmem:[%s1019_s0 + $0x10] sm:$0xff] }
   0x2   :  { %v439_v1 = vld [vmem:[%s1020_s1] ss:$0 sm:$0xff]  ;;  %v17_v7 = vld [vmem:[%s1019_s0 + $0x18] sm:$0xff]  ;;  %v19_v12 = vld [vmem:[%s1019_s0 + $0x28] sm:$0xff] }
   0x3   :  { %v444_v2 = vld [vmem:[%s1021_s2] ss:$0 sm:$0xff]  ;;  %v82_v4 = vmul.f32 %v439_v1, %v14_v0  ;;  %v83_v5 = vmul.f32 %v439_v1, %v15_v3  ;;  %v84_v9 = vmul.f32 %v439_v1, %v16_v6  ;;  %v85_v10 = vmul.f32 %v439_v1, %v17_v7  ;;  %v20_v13 = vld [vmem:[%s1019_s0 + $0x30] sm:$0xff]  ;;  %v21_v14 = vld [vmem:[%s1019_s0 + $0x38] sm:$0xff] }
   0x4   :  { %v18_v8 = vld [vmem:[%s1019_s0 + $0x20] sm:$0xff]  ;;  %v87_v17 = vmul.f32 %v439_v1, %v19_v12  ;;  %v88_v18 = vmul.f32 %v439_v1, %v20_v13  ;;  %v89_v22 = vmul.f32 %v439_v1, %v21_v14  ;;  %v23_v32 = vld [vmem:[%s1019_s0 + $0x48] sm:$0xff]  ;;  %v24_v37 = vld [vmem:[%s1019_s0 + $0x50] sm:$0xff] }
   0x5   :  { %v86_v11 = vmul.f32 %v439_v1, %v18_v8  ;;  %v150_v15 = vadd.f32 %v444_v2, %v82_v4  ;;  %v151_v16 = vadd.f32 %v444_v2, %v83_v5  ;;  %v152_v19 = vadd.f32 %v444_v2, %v84_v9  ;;  %v22_v31 = vld [vmem:[%s1019_s0 + $0x40] sm:$0xff]  ;;  %v25_v38 = vld [vmem:[%s1019_s0 + $0x58] sm:$0xff]  ;;  %v27_v44 = vld [vmem:[%s1019_s0 + $0x68] sm:$0xff] }
   0x6   :  { %v153_v20 = vadd.f32 %v444_v2, %v85_v10  ;;  %v155_v25 = vadd.f32 %v444_v2, %v87_v17  ;;  %v156_v26 = vadd.f32 %v444_v2, %v88_v18  ;;  %v157_v30 = vadd.f32 %v444_v2, %v89_v22  ;;  %v26_v39 = vld [vmem:[%s1019_s0 + $0x60] sm:$0xff]  ;;  %v28_v45 = vld [vmem:[%s1019_s0 + $0x70] sm:$0xff]  ;;  %v29_v50 = vld [vmem:[%s1019_s0 + $0x78] sm:$0xff] }
   0x7   :  { %v154_v21 = vadd.f32 %v444_v2, %v86_v11  ;;  %v214_v23 = vmax.f32 %v150_v15, 0.0  ;;  %v215_v24 = vmax.f32 %v151_v16, 0.0  ;;  %v216_v27 = vmax.f32 %v152_v19, 0.0  ;;  %v30_v5 = vld [vmem:[%s1019_s0 + $0x80] sm:$0xff]  ;;  %v31_v6 = vld [vmem:[%s1019_s0 + $0x88] sm:$0xff]  ;;  %v32_v11 = vld [vmem:[%s1019_s0 + $0x90] sm:$0xff] }
   0x8   :  { %v217_v28 = vmax.f32 %v153_v20, 0.0  ;;  %v219_v35 = vmax.f32 %v155_v25, 0.0  ;;  %v220_v36 = vmax.f32 %v156_v26, 0.0  ;;  %v221_v43 = vmax.f32 %v157_v30, 0.0  ;;  %v33_v16 = vld [vmem:[%s1019_s0 + $0x98] sm:$0xff]  ;;  %v34_v17 = vld [vmem:[%s1019_s0 + $0xa0] sm:$0xff] }
   0x9   :  { %v218_v29 = vmax.f32 %v154_v21, 0.0  ;;  %v278_v33 = vpack.c.bf16 %v214_v23, %v214_v23  ;;  %v279_v34 = vpack.c.bf16 %v215_v24, %v215_v24  ;;  %v280_v40 = vpack.c.bf16 %v216_v27, %v216_v27  ;;  %v35_v22 = vld [vmem:[%s1019_s0 + $0xa8] sm:$0xff]  ;;  %v36_v23 = vld [vmem:[%s1019_s0 + $0xb0] sm:$0xff] }
   0xa   :  { %v281_v41 = vpack.c.bf16 %v217_v28, %v217_v28  ;;  %v283_v46 = vpack.c.bf16 %v219_v35, %v219_v35  ;;  %v284_v47 = vpack.c.bf16 %v220_v36, %v220_v36  ;;  %v90_v48 = vmul.f32 %v439_v1, %v22_v31  ;;  %v37_v28 = vld [vmem:[%s1019_s0 + $0xb8] sm:$0xff] }
   0xb   :  { %v282_v42 = vpack.c.bf16 %v218_v29, %v218_v29  ;;  %343 = vst.msk [vmem:[%s1022_s3] sm:$0xf] %vm342_vm0, %v278_v33  ;;  %v91_v49 = vmul.f32 %v439_v1, %v23_v32  ;;  %v285_v51 = vpack.c.bf16 %v221_v43, %v221_v43  ;;  %v92_v52 = vmul.f32 %v439_v1, %v24_v37 }
   0xc   :  { %344 = vst.msk [vmem:[%s1022_s3 + $0x4] sm:$0xf] %vm342_vm0, %v279_v34  ;;  %v93_v53 = vmul.f32 %v439_v1, %v25_v38  ;;  %v94_v54 = vmul.f32 %v439_v1, %v26_v39  ;;  %v158_v55 = vadd.f32 %v444_v2, %v90_v48  ;;  %v95_v57 = vmul.f32 %v439_v1, %v27_v44 }
   0xd   :  { %345 = vst.msk [vmem:[%s1022_s3 + $0x8] sm:$0xf] %vm342_vm0, %v280_v40  ;;  %v159_v56 = vadd.f32 %v444_v2, %v91_v49  ;;  %v96_v58 = vmul.f32 %v439_v1, %v28_v45  ;;  %v160_v59 = vadd.f32 %v444_v2, %v92_v52  ;;  %v97_v62 = vmul.f32 %v439_v1, %v29_v50  ;;  %v38_v45 = vld [vmem:[%s1019_s0 + $0xc0] sm:$0xff] }
   0xe   :  { %346 = vst.msk [vmem:[%s1022_s3 + $0xc] sm:$0xf] %vm342_vm0, %v281_v41  ;;  %v161_v60 = vadd.f32 %v444_v2, %v93_v53  ;;  %v162_v61 = vadd.f32 %v444_v2, %v94_v54  ;;  %v222_v63 = vmax.f32 %v158_v55, 0.0  ;;  %v163_v3 = vadd.f32 %v444_v2, %v95_v57  ;;  %v42_v57 = vld [vmem:[%s1019_s0 + $0xe0] sm:$0xff] }
   0xf   :  { %347 = vst.msk [vmem:[%s1022_s3 + $0x10] sm:$0xf] %vm342_vm0, %v282_v42  ;;  %v223_v0 = vmax.f32 %v159_v56, 0.0  ;;  %v164_v4 = vadd.f32 %v444_v2, %v96_v58  ;;  %v224_v7 = vmax.f32 %v160_v59, 0.0  ;;  %v165_v10 = vadd.f32 %v444_v2, %v97_v62  ;;  %v41_v56 = vld [vmem:[%s1019_s0 + $0xd8] sm:$0xff]  ;;  %v43_v62 = vld [vmem:[%s1019_s0 + $0xe8] sm:$0xff] }
  0x10   :  { %348 = vst.msk [vmem:[%s1022_s3 + $0x14] sm:$0xf] %vm342_vm0, %v283_v46  ;;  %v225_v8 = vmax.f32 %v161_v60, 0.0  ;;  %v226_v9 = vmax.f32 %v162_v61, 0.0  ;;  %v286_v12 = vpack.c.bf16 %v222_v63, %v222_v63  ;;  %v227_v14 = vmax.f32 %v163_v3, 0.0  ;;  %v39_v46 = vld [vmem:[%s1019_s0 + $0xc8] sm:$0xff] }
  0x11   :  { %349 = vst.msk [vmem:[%s1022_s3 + $0x18] sm:$0xf] %vm342_vm0, %v284_v47  ;;  %v287_v13 = vpack.c.bf16 %v223_v0, %v223_v0  ;;  %v228_v15 = vmax.f32 %v164_v4, 0.0  ;;  %v288_v18 = vpack.c.bf16 %v224_v7, %v224_v7  ;;  %v229_v21 = vmax.f32 %v165_v10, 0.0  ;;  %v44_v63 = vld [vmem:[%s1019_s0 + $0xf0] sm:$0xff] }
  0x12   :  { %350 = vst.msk [vmem:[%s1022_s3 + $0x1c] sm:$0xf] %vm342_vm0, %v285_v51  ;;  %v289_v19 = vpack.c.bf16 %v225_v8, %v225_v8  ;;  %v290_v20 = vpack.c.bf16 %v226_v9, %v226_v9  ;;  %v291_v24 = vpack.c.bf16 %v227_v14, %v227_v14  ;;  %v98_v26 = vmul.f32 %v439_v1, %v30_v5  ;;  %v40_v51 = vld [vmem:[%s1019_s0 + $0xd0] sm:$0xff] }
  0x13   :  { %351 = vst.msk [vmem:[%s1022_s3 + $0x20] sm:$0xf] %vm342_vm0, %v286_v12  ;;  %v292_v25 = vpack.c.bf16 %v228_v15, %v228_v15  ;;  %v99_v27 = vmul.f32 %v439_v1, %v31_v6  ;;  %v293_v29 = vpack.c.bf16 %v229_v21, %v229_v21  ;;  %v100_v30 = vmul.f32 %v439_v1, %v32_v11  ;;  %v45_v6 = vld [vmem:[%s1019_s0 + $0xf8] sm:$0xff] }
  0x14   :  { %352 = vst.msk [vmem:[%s1022_s3 + $0x24] sm:$0xf] %vm342_vm0, %v287_v13  ;;  %v101_v31 = vmul.f32 %v439_v1, %v33_v16  ;;  %v102_v32 = vmul.f32 %v439_v1, %v34_v17  ;;  %v166_v33 = vadd.f32 %v444_v2, %v98_v26  ;;  %v103_v35 = vmul.f32 %v439_v1, %v35_v22 }
  0x15   :  { %353 = vst.msk [vmem:[%s1022_s3 + $0x28] sm:$0xf] %vm342_vm0, %v288_v18  ;;  %v167_v34 = vadd.f32 %v444_v2, %v99_v27  ;;  %v104_v36 = vmul.f32 %v439_v1, %v36_v23  ;;  %v168_v37 = vadd.f32 %v444_v2, %v100_v30  ;;  %v105_v40 = vmul.f32 %v439_v1, %v37_v28  ;;  %v46_v23 = vld [vmem:[%s1019_s0 + $0x100] sm:$0xff] }
  0x16   :  { %354 = vst.msk [vmem:[%s1022_s3 + $0x2c] sm:$0xf] %vm342_vm0, %v289_v19  ;;  %v169_v38 = vadd.f32 %v444_v2, %v101_v31  ;;  %v170_v39 = vadd.f32 %v444_v2, %v102_v32  ;;  %v230_v41 = vmax.f32 %v166_v33, 0.0  ;;  %v171_v43 = vadd.f32 %v444_v2, %v103_v35  ;;  %v50_v35 = vld [vmem:[%s1019_s0 + $0x120] sm:$0xff] }
  0x17   :  { %355 = vst.msk [vmem:[%s1022_s3 + $0x30] sm:$0xf] %vm342_vm0, %v290_v20  ;;  %v231_v42 = vmax.f32 %v167_v34, 0.0  ;;  %v172_v44 = vadd.f32 %v444_v2, %v104_v36  ;;  %v232_v47 = vmax.f32 %v168_v37, 0.0  ;;  %v173_v50 = vadd.f32 %v444_v2, %v105_v40  ;;  %v49_v34 = vld [vmem:[%s1019_s0 + $0x118] sm:$0xff]  ;;  %v51_v40 = vld [vmem:[%s1019_s0 + $0x128] sm:$0xff] }
  0x18   :  { %356 = vst.msk [vmem:[%s1022_s3 + $0x34] sm:$0xf] %vm342_vm0, %v291_v24  ;;  %v233_v48 = vmax.f32 %v169_v38, 0.0  ;;  %v234_v49 = vmax.f32 %v170_v39, 0.0  ;;  %v294_v52 = vpack.c.bf16 %v230_v41, %v230_v41  ;;  %v235_v54 = vmax.f32 %v171_v43, 0.0  ;;  %v47_v24 = vld [vmem:[%s1019_s0 + $0x108] sm:$0xff] }
  0x19   :  { %357 = vst.msk [vmem:[%s1022_s3 + $0x38] sm:$0xf] %vm342_vm0, %v292_v25  ;;  %v295_v53 = vpack.c.bf16 %v231_v42, %v231_v42  ;;  %v236_v55 = vmax.f32 %v172_v44, 0.0  ;;  %v296_v58 = vpack.c.bf16 %v232_v47, %v232_v47  ;;  %v237_v61 = vmax.f32 %v173_v50, 0.0  ;;  %v52_v41 = vld [vmem:[%s1019_s0 + $0x130] sm:$0xff] }
  0x1a   :  { %358 = vst.msk [vmem:[%s1022_s3 + $0x3c] sm:$0xf] %vm342_vm0, %v293_v29  ;;  %v297_v59 = vpack.c.bf16 %v233_v48, %v233_v48  ;;  %v298_v60 = vpack.c.bf16 %v234_v49, %v234_v49  ;;  %v299_v0 = vpack.c.bf16 %v235_v54, %v235_v54  ;;  %v106_v4 = vmul.f32 %v439_v1, %v38_v45  ;;  %v48_v29 = vld [vmem:[%s1019_s0 + $0x110] sm:$0xff] }
  0x1b   :  { %359 = vst.msk [vmem:[%s1022_s3 + $0x40] sm:$0xf] %vm342_vm0, %v294_v52  ;;  %v300_v3 = vpack.c.bf16 %v236_v55, %v236_v55  ;;  %v107_v5 = vmul.f32 %v439_v1, %v39_v46  ;;  %v301_v7 = vpack.c.bf16 %v237_v61, %v237_v61  ;;  %v108_v8 = vmul.f32 %v439_v1, %v40_v51  ;;  %v53_v46 = vld [vmem:[%s1019_s0 + $0x138] sm:$0xff] }
  0x1c   :  { %360 = vst.msk [vmem:[%s1022_s3 + $0x44] sm:$0xf] %vm342_vm0, %v295_v53  ;;  %v109_v9 = vmul.f32 %v439_v1, %v41_v56  ;;  %v110_v10 = vmul.f32 %v439_v1, %v42_v57  ;;  %v174_v11 = vadd.f32 %v444_v2, %v106_v4  ;;  %v111_v13 = vmul.f32 %v439_v1, %v43_v62 }
  0x1d   :  { %361 = vst.msk [vmem:[%s1022_s3 + $0x48] sm:$0xf] %vm342_vm0, %v296_v58  ;;  %v175_v12 = vadd.f32 %v444_v2, %v107_v5  ;;  %v112_v14 = vmul.f32 %v439_v1, %v44_v63  ;;  %v176_v15 = vadd.f32 %v444_v2, %v108_v8  ;;  %v113_v18 = vmul.f32 %v439_v1, %v45_v6  ;;  %v54_v63 = vld [vmem:[%s1019_s0 + $0x140] sm:$0xff] }
  0x1e   :  { %362 = vst.msk [vmem:[%s1022_s3 + $0x4c] sm:$0xf] %vm342_vm0, %v297_v59  ;;  %v177_v16 = vadd.f32 %v444_v2, %v109_v9  ;;  %v178_v17 = vadd.f32 %v444_v2, %v110_v10  ;;  %v238_v19 = vmax.f32 %v174_v11, 0.0  ;;  %v179_v21 = vadd.f32 %v444_v2, %v111_v13  ;;  %v58_v13 = vld [vmem:[%s1019_s0 + $0x160] sm:$0xff] }
  0x1f   :  { %363 = vst.msk [vmem:[%s1022_s3 + $0x50] sm:$0xf] %vm342_vm0, %v298_v60  ;;  %v239_v20 = vmax.f32 %v175_v12, 0.0  ;;  %v180_v22 = vadd.f32 %v444_v2, %v112_v14  ;;  %v240_v25 = vmax.f32 %v176_v15, 0.0  ;;  %v181_v28 = vadd.f32 %v444_v2, %v113_v18  ;;  %v57_v12 = vld [vmem:[%s1019_s0 + $0x158] sm:$0xff]  ;;  %v59_v18 = vld [vmem:[%s1019_s0 + $0x168] sm:$0xff] }
  0x20   :  { %364 = vst.msk [vmem:[%s1022_s3 + $0x54] sm:$0xf] %vm342_vm0, %v299_v0  ;;  %v241_v26 = vmax.f32 %v177_v16, 0.0  ;;  %v242_v27 = vmax.f32 %v178_v17, 0.0  ;;  %v302_v30 = vpack.c.bf16 %v238_v19, %v238_v19  ;;  %v243_v32 = vmax.f32 %v179_v21, 0.0  ;;  %v55_v0 = vld [vmem:[%s1019_s0 + $0x148] sm:$0xff] }
  0x21   :  { %365 = vst.msk [vmem:[%s1022_s3 + $0x58] sm:$0xf] %vm342_vm0, %v300_v3  ;;  %v303_v31 = vpack.c.bf16 %v239_v20, %v239_v20  ;;  %v244_v33 = vmax.f32 %v180_v22, 0.0  ;;  %v304_v36 = vpack.c.bf16 %v240_v25, %v240_v25  ;;  %v245_v39 = vmax.f32 %v181_v28, 0.0  ;;  %v60_v19 = vld [vmem:[%s1019_s0 + $0x170] sm:$0xff] }
  0x22   :  { %366 = vst.msk [vmem:[%s1022_s3 + $0x5c] sm:$0xf] %vm342_vm0, %v301_v7  ;;  %v305_v37 = vpack.c.bf16 %v241_v26, %v241_v26  ;;  %v306_v38 = vpack.c.bf16 %v242_v27, %v242_v27  ;;  %v307_v42 = vpack.c.bf16 %v243_v32, %v243_v32  ;;  %v114_v44 = vmul.f32 %v439_v1, %v46_v23  ;;  %v56_v7 = vld [vmem:[%s1019_s0 + $0x150] sm:$0xff] }
  0x23   :  { %367 = vst.msk [vmem:[%s1022_s3 + $0x60] sm:$0xf] %vm342_vm0, %v302_v30  ;;  %v308_v43 = vpack.c.bf16 %v244_v33, %v244_v33  ;;  %v115_v45 = vmul.f32 %v439_v1, %v47_v24  ;;  %v309_v47 = vpack.c.bf16 %v245_v39, %v245_v39  ;;  %v116_v48 = vmul.f32 %v439_v1, %v48_v29  ;;  %v61_v24 = vld [vmem:[%s1019_s0 + $0x178] sm:$0xff] }
  0x24   :  { %368 = vst.msk [vmem:[%s1022_s3 + $0x64] sm:$0xf] %vm342_vm0, %v303_v31  ;;  %v117_v49 = vmul.f32 %v439_v1, %v49_v34  ;;  %v118_v50 = vmul.f32 %v439_v1, %v50_v35  ;;  %v182_v51 = vadd.f32 %v444_v2, %v114_v44  ;;  %v119_v53 = vmul.f32 %v439_v1, %v51_v40 }
  0x25   :  { %369 = vst.msk [vmem:[%s1022_s3 + $0x68] sm:$0xf] %vm342_vm0, %v304_v36  ;;  %v183_v52 = vadd.f32 %v444_v2, %v115_v45  ;;  %v120_v54 = vmul.f32 %v439_v1, %v52_v41  ;;  %v184_v55 = vadd.f32 %v444_v2, %v116_v48  ;;  %v121_v58 = vmul.f32 %v439_v1, %v53_v46  ;;  %v62_v41 = vld [vmem:[%s1019_s0 + $0x180] sm:$0xff] }
  0x26   :  { %370 = vst.msk [vmem:[%s1022_s3 + $0x6c] sm:$0xf] %vm342_vm0, %v305_v37  ;;  %v185_v56 = vadd.f32 %v444_v2, %v117_v49  ;;  %v186_v57 = vadd.f32 %v444_v2, %v118_v50  ;;  %v246_v59 = vmax.f32 %v182_v51, 0.0  ;;  %v187_v61 = vadd.f32 %v444_v2, %v119_v53  ;;  %v66_v53 = vld [vmem:[%s1019_s0 + $0x1a0] sm:$0xff] }
  0x27   :  { %371 = vst.msk [vmem:[%s1022_s3 + $0x70] sm:$0xf] %vm342_vm0, %v306_v38  ;;  %v247_v60 = vmax.f32 %v183_v52, 0.0  ;;  %v188_v62 = vadd.f32 %v444_v2, %v120_v54  ;;  %v248_v3 = vmax.f32 %v184_v55, 0.0  ;;  %v189_v6 = vadd.f32 %v444_v2, %v121_v58  ;;  %v65_v52 = vld [vmem:[%s1019_s0 + $0x198] sm:$0xff]  ;;  %v67_v58 = vld [vmem:[%s1019_s0 + $0x1a8] sm:$0xff] }
  0x28   :  { %372 = vst.msk [vmem:[%s1022_s3 + $0x74] sm:$0xf] %vm342_vm0, %v307_v42  ;;  %v249_v4 = vmax.f32 %v185_v56, 0.0  ;;  %v250_v5 = vmax.f32 %v186_v57, 0.0  ;;  %v310_v8 = vpack.c.bf16 %v246_v59, %v246_v59  ;;  %v251_v10 = vmax.f32 %v187_v61, 0.0  ;;  %v63_v42 = vld [vmem:[%s1019_s0 + $0x188] sm:$0xff] }
  0x29   :  { %373 = vst.msk [vmem:[%s1022_s3 + $0x78] sm:$0xf] %vm342_vm0, %v308_v43  ;;  %v311_v9 = vpack.c.bf16 %v247_v60, %v247_v60  ;;  %v252_v11 = vmax.f32 %v188_v62, 0.0  ;;  %v312_v14 = vpack.c.bf16 %v248_v3, %v248_v3  ;;  %v253_v17 = vmax.f32 %v189_v6, 0.0  ;;  %v68_v59 = vld [vmem:[%s1019_s0 + $0x1b0] sm:$0xff] }
  0x2a   :  { %374 = vst.msk [vmem:[%s1022_s3 + $0x7c] sm:$0xf] %vm342_vm0, %v309_v47  ;;  %v313_v15 = vpack.c.bf16 %v249_v4, %v249_v4  ;;  %v314_v16 = vpack.c.bf16 %v250_v5, %v250_v5  ;;  %v315_v20 = vpack.c.bf16 %v251_v10, %v251_v10  ;;  %v122_v22 = vmul.f32 %v439_v1, %v54_v63  ;;  %v64_v47 = vld [vmem:[%s1019_s0 + $0x190] sm:$0xff] }
  0x2b   :  { %375 = vst.msk [vmem:[%s1022_s3 + $0x80] sm:$0xf] %vm342_vm0, %v310_v8  ;;  %v316_v21 = vpack.c.bf16 %v252_v11, %v252_v11  ;;  %v123_v23 = vmul.f32 %v439_v1, %v55_v0  ;;  %v317_v25 = vpack.c.bf16 %v253_v17, %v253_v17  ;;  %v124_v26 = vmul.f32 %v439_v1, %v56_v7  ;;  %v69_v0 = vld [vmem:[%s1019_s0 + $0x1b8] sm:$0xff] }
  0x2c   :  { %376 = vst.msk [vmem:[%s1022_s3 + $0x84] sm:$0xf] %vm342_vm0, %v311_v9  ;;  %v125_v27 = vmul.f32 %v439_v1, %v57_v12  ;;  %v126_v28 = vmul.f32 %v439_v1, %v58_v13  ;;  %v190_v29 = vadd.f32 %v444_v2, %v122_v22  ;;  %v127_v31 = vmul.f32 %v439_v1, %v59_v18 }
  0x2d   :  { %377 = vst.msk [vmem:[%s1022_s3 + $0x88] sm:$0xf] %vm342_vm0, %v312_v14  ;;  %v191_v30 = vadd.f32 %v444_v2, %v123_v23  ;;  %v128_v32 = vmul.f32 %v439_v1, %v60_v19  ;;  %v192_v33 = vadd.f32 %v444_v2, %v124_v26  ;;  %v129_v36 = vmul.f32 %v439_v1, %v61_v24  ;;  %v70_v19 = vld [vmem:[%s1019_s0 + $0x1c0] sm:$0xff] }
  0x2e   :  { %378 = vst.msk [vmem:[%s1022_s3 + $0x8c] sm:$0xf] %vm342_vm0, %v313_v15  ;;  %v193_v34 = vadd.f32 %v444_v2, %v125_v27  ;;  %v194_v35 = vadd.f32 %v444_v2, %v126_v28  ;;  %v254_v37 = vmax.f32 %v190_v29, 0.0  ;;  %v195_v39 = vadd.f32 %v444_v2, %v127_v31  ;;  %v74_v31 = vld [vmem:[%s1019_s0 + $0x1e0] sm:$0xff] }
  0x2f   :  { %379 = vst.msk [vmem:[%s1022_s3 + $0x90] sm:$0xf] %vm342_vm0, %v314_v16  ;;  %v255_v38 = vmax.f32 %v191_v30, 0.0  ;;  %v196_v40 = vadd.f32 %v444_v2, %v128_v32  ;;  %v256_v43 = vmax.f32 %v192_v33, 0.0  ;;  %v197_v46 = vadd.f32 %v444_v2, %v129_v36  ;;  %v73_v30 = vld [vmem:[%s1019_s0 + $0x1d8] sm:$0xff]  ;;  %v75_v36 = vld [vmem:[%s1019_s0 + $0x1e8] sm:$0xff] }
  0x30   :  { %380 = vst.msk [vmem:[%s1022_s3 + $0x94] sm:$0xf] %vm342_vm0, %v315_v20  ;;  %v257_v44 = vmax.f32 %v193_v34, 0.0  ;;  %v258_v45 = vmax.f32 %v194_v35, 0.0  ;;  %v318_v48 = vpack.c.bf16 %v254_v37, %v254_v37  ;;  %v259_v50 = vmax.f32 %v195_v39, 0.0  ;;  %v71_v20 = vld [vmem:[%s1019_s0 + $0x1c8] sm:$0xff] }
  0x31   :  { %381 = vst.msk [vmem:[%s1022_s3 + $0x98] sm:$0xf] %vm342_vm0, %v316_v21  ;;  %v319_v49 = vpack.c.bf16 %v255_v38, %v255_v38  ;;  %v260_v51 = vmax.f32 %v196_v40, 0.0  ;;  %v320_v54 = vpack.c.bf16 %v256_v43, %v256_v43  ;;  %v261_v57 = vmax.f32 %v197_v46, 0.0  ;;  %v76_v37 = vld [vmem:[%s1019_s0 + $0x1f0] sm:$0xff] }
  0x32   :  { %382 = vst.msk [vmem:[%s1022_s3 + $0x9c] sm:$0xf] %vm342_vm0, %v317_v25  ;;  %v321_v55 = vpack.c.bf16 %v257_v44, %v257_v44  ;;  %v322_v56 = vpack.c.bf16 %v258_v45, %v258_v45  ;;  %v323_v60 = vpack.c.bf16 %v259_v50, %v259_v50  ;;  %v130_v62 = vmul.f32 %v439_v1, %v62_v41  ;;  %v72_v25 = vld [vmem:[%s1019_s0 + $0x1d0] sm:$0xff] }
  0x33   :  { %383 = vst.msk [vmem:[%s1022_s3 + $0xa0] sm:$0xf] %vm342_vm0, %v318_v48  ;;  %v324_v61 = vpack.c.bf16 %v260_v51, %v260_v51  ;;  %v131_v63 = vmul.f32 %v439_v1, %v63_v42  ;;  %v325_v3 = vpack.c.bf16 %v261_v57, %v261_v57  ;;  %v132_v4 = vmul.f32 %v439_v1, %v64_v47  ;;  %v77_v42 = vld [vmem:[%s1019_s0 + $0x1f8] sm:$0xff] }
  0x34   :  { %384 = vst.msk [vmem:[%s1022_s3 + $0xa4] sm:$0xf] %vm342_vm0, %v319_v49  ;;  %v133_v5 = vmul.f32 %v439_v1, %v65_v52  ;;  %v134_v6 = vmul.f32 %v439_v1, %v66_v53  ;;  %v198_v7 = vadd.f32 %v444_v2, %v130_v62  ;;  %v135_v9 = vmul.f32 %v439_v1, %v67_v58 }
  0x35   :  { %385 = vst.msk [vmem:[%s1022_s3 + $0xa8] sm:$0xf] %vm342_vm0, %v320_v54  ;;  %v199_v8 = vadd.f32 %v444_v2, %v131_v63  ;;  %v136_v10 = vmul.f32 %v439_v1, %v68_v59  ;;  %v200_v11 = vadd.f32 %v444_v2, %v132_v4  ;;  %v137_v14 = vmul.f32 %v439_v1, %v69_v0 }
  0x36   :  { %386 = vst.msk [vmem:[%s1022_s3 + $0xac] sm:$0xf] %vm342_vm0, %v321_v55  ;;  %v201_v12 = vadd.f32 %v444_v2, %v133_v5  ;;  %v202_v13 = vadd.f32 %v444_v2, %v134_v6  ;;  %v262_v15 = vmax.f32 %v198_v7, 0.0  ;;  %v203_v17 = vadd.f32 %v444_v2, %v135_v9 }
  0x37   :  { %387 = vst.msk [vmem:[%s1022_s3 + $0xb0] sm:$0xf] %vm342_vm0, %v322_v56  ;;  %v263_v16 = vmax.f32 %v199_v8, 0.0  ;;  %v204_v18 = vadd.f32 %v444_v2, %v136_v10  ;;  %v264_v21 = vmax.f32 %v200_v11, 0.0  ;;  %v205_v24 = vadd.f32 %v444_v2, %v137_v14 }
  0x38   :  { %388 = vst.msk [vmem:[%s1022_s3 + $0xb4] sm:$0xf] %vm342_vm0, %v323_v60  ;;  %v265_v22 = vmax.f32 %v201_v12, 0.0  ;;  %v266_v23 = vmax.f32 %v202_v13, 0.0  ;;  %v326_v26 = vpack.c.bf16 %v262_v15, %v262_v15  ;;  %v267_v28 = vmax.f32 %v203_v17, 0.0 }
  0x39   :  { %389 = vst.msk [vmem:[%s1022_s3 + $0xb8] sm:$0xf] %vm342_vm0, %v324_v61  ;;  %v327_v27 = vpack.c.bf16 %v263_v16, %v263_v16  ;;  %v268_v29 = vmax.f32 %v204_v18, 0.0  ;;  %v328_v32 = vpack.c.bf16 %v264_v21, %v264_v21  ;;  %v269_v35 = vmax.f32 %v205_v24, 0.0 }
  0x3a   :  { %390 = vst.msk [vmem:[%s1022_s3 + $0xbc] sm:$0xf] %vm342_vm0, %v325_v3  ;;  %v329_v33 = vpack.c.bf16 %v265_v22, %v265_v22  ;;  %v330_v34 = vpack.c.bf16 %v266_v23, %v266_v23  ;;  %v331_v38 = vpack.c.bf16 %v267_v28, %v267_v28  ;;  %v138_v40 = vmul.f32 %v439_v1, %v70_v19 }
  0x3b   :  { %391 = vst.msk [vmem:[%s1022_s3 + $0xc0] sm:$0xf] %vm342_vm0, %v326_v26  ;;  %v332_v39 = vpack.c.bf16 %v268_v29, %v268_v29  ;;  %v139_v41 = vmul.f32 %v439_v1, %v71_v20  ;;  %v333_v43 = vpack.c.bf16 %v269_v35, %v269_v35  ;;  %v140_v44 = vmul.f32 %v439_v1, %v72_v25 }
  0x3c   :  { %392 = vst.msk [vmem:[%s1022_s3 + $0xc4] sm:$0xf] %vm342_vm0, %v327_v27  ;;  %v141_v45 = vmul.f32 %v439_v1, %v73_v30  ;;  %v142_v46 = vmul.f32 %v439_v1, %v74_v31  ;;  %v206_v47 = vadd.f32 %v444_v2, %v138_v40  ;;  %v143_v49 = vmul.f32 %v439_v1, %v75_v36 }
  0x3d   :  { %393 = vst.msk [vmem:[%s1022_s3 + $0xc8] sm:$0xf] %vm342_vm0, %v328_v32  ;;  %v207_v48 = vadd.f32 %v444_v2, %v139_v41  ;;  %v144_v50 = vmul.f32 %v439_v1, %v76_v37  ;;  %v208_v51 = vadd.f32 %v444_v2, %v140_v44  ;;  %v145_v54 = vmul.f32 %v439_v1, %v77_v42 }
  0x3e   :  { %394 = vst.msk [vmem:[%s1022_s3 + $0xcc] sm:$0xf] %vm342_vm0, %v329_v33  ;;  %v209_v52 = vadd.f32 %v444_v2, %v141_v45  ;;  %v210_v53 = vadd.f32 %v444_v2, %v142_v46  ;;  %v270_v55 = vmax.f32 %v206_v47, 0.0  ;;  %v211_v57 = vadd.f32 %v444_v2, %v143_v49 }
  0x3f   :  { %395 = vst.msk [vmem:[%s1022_s3 + $0xd0] sm:$0xf] %vm342_vm0, %v330_v34  ;;  %v271_v56 = vmax.f32 %v207_v48, 0.0  ;;  %v212_v58 = vadd.f32 %v444_v2, %v144_v50  ;;  %v272_v59 = vmax.f32 %v208_v51, 0.0  ;;  %v213_v1 = vadd.f32 %v444_v2, %v145_v54 }
  0x40   :  { %396 = vst.msk [vmem:[%s1022_s3 + $0xd4] sm:$0xf] %vm342_vm0, %v331_v38  ;;  %v273_v60 = vmax.f32 %v209_v52, 0.0  ;;  %v274_v61 = vmax.f32 %v210_v53, 0.0  ;;  %v334_v62 = vpack.c.bf16 %v270_v55, %v270_v55  ;;  %v275_v0 = vmax.f32 %v211_v57, 0.0 }
  0x41   :  { %397 = vst.msk [vmem:[%s1022_s3 + $0xd8] sm:$0xf] %vm342_vm0, %v332_v39  ;;  %v335_v63 = vpack.c.bf16 %v271_v56, %v271_v56  ;;  %v276_v3 = vmax.f32 %v212_v58, 0.0  ;;  %v336_v4 = vpack.c.bf16 %v272_v59, %v272_v59  ;;  %v277_v6 = vmax.f32 %v213_v1, 0.0 }
  0x42   :  { %398 = vst.msk [vmem:[%s1022_s3 + $0xdc] sm:$0xf] %vm342_vm0, %v333_v43  ;;  %v337_v5 = vpack.c.bf16 %v273_v60, %v273_v60  ;;  %v338_v2 = vpack.c.bf16 %v274_v61, %v274_v61  ;;  %v339_v7 = vpack.c.bf16 %v275_v0, %v275_v0 }
  0x43   :  { %399 = vst.msk [vmem:[%s1022_s3 + $0xe0] sm:$0xf] %vm342_vm0, %v334_v62  ;;  %v340_v8 = vpack.c.bf16 %v276_v3, %v276_v3  ;;  %v341_v9 = vpack.c.bf16 %v277_v6, %v277_v6 }
  0x44   :  { %400 = vst.msk [vmem:[%s1022_s3 + $0xe4] sm:$0xf] %vm342_vm0, %v335_v63 }
  0x45   :  { %401 = vst.msk [vmem:[%s1022_s3 + $0xe8] sm:$0xf] %vm342_vm0, %v336_v4 }
  0x46   :  { %402 = vst.msk [vmem:[%s1022_s3 + $0xec] sm:$0xf] %vm342_vm0, %v337_v5 }
  0x47   :  { %403 = vst.msk [vmem:[%s1022_s3 + $0xf0] sm:$0xf] %vm342_vm0, %v338_v2 }
  0x48   :  { %404 = vst.msk [vmem:[%s1022_s3 + $0xf4] sm:$0xf] %vm342_vm0, %v339_v7 }
  0x49   :  { %405 = vst.msk [vmem:[%s1022_s3 + $0xf8] sm:$0xf] %vm342_vm0, %v340_v8 }
  0x4a   :  { %406 = vst.msk [vmem:[%s1022_s3 + $0xfc] sm:$0xf] %vm342_vm0, %v341_v9 }

</bundles_post_ra>
